<compile_context>
chip_gen: v7x
topology: tpu7x:2x2x1
jax: 0.10.0
libtpu: 0.0.40
codegen_flags: <defaults>
</compile_context>

<pallas_src>
import functools

import jax
import jax.numpy as jnp
from jax.experimental import pallas as pl
from jax.experimental.pallas import tpu as pltpu

BN_EPS = 1e-5  # PyTorch BatchNorm2d default eps
_MiB = 1024 * 1024


# ----------------------------------------------------------------------------
# Budget helpers (generation-aware tiling / VMEM limits)
# ----------------------------------------------------------------------------
def _round_up(v, m):
    return (v + m - 1) // m * m


def _vmem_capacity_bytes():
    try:
        info = pltpu.get_tpu_info()
        cap = getattr(info, "vmem_capacity_bytes", None)
        if cap:
            return int(cap)
    except Exception:
        pass
    return 64 * _MiB  # conservative fallback (v7x per-core VMEM)


def _budgets():
    cap = _vmem_capacity_bytes()
    # Explicit scoped-VMEM limit (default scoped limits are much smaller than
    # physical VMEM and would reject the larger blocks below).
    vmem_limit = int(min(cap * 3 // 4, 96 * _MiB))
    # Per-block byte target: bigger blocks amortize the ~0.35us per-grid-step
    # overhead; v7x (64 MiB VMEM) gets a tighter target than v5e/v6e (128 MiB).
    block_target = (4 if cap <= 64 * _MiB else 6) * _MiB
    return vmem_limit, block_target


def _pick_tiles(nc, hw, itemsize, target_bytes):
    """Pick (row_tile, hw_tile) for the [N*C, HW] layout.

    row_tile is a multiple of 8 that divides NC (or the full NC when NC is not
    8-aligned).  hw_tile is a multiple of 128 (or the full HW) sized so one
    sublane-padded x block is ~target_bytes.  HW need not divide hw_tile; the
    ragged last tile is masked in the stats kernel.
    """
    rows_aligned = (nc % 8 == 0)
    base_rows = 8 if rows_aligned else nc
    pad_rows = _round_up(base_rows, 8)

    hw_cap = _round_up(hw, 128)
    t = max(128, (target_bytes // (pad_rows * itemsize)) // 128 * 128)
    hw_tile = min(t, hw_cap)
    if hw_tile >= hw:
        hw_tile = hw  # full-dim block: lane-exemption, never ragged

    row_tile = base_rows
    if rows_aligned:
        # If a single lane tile already covers all of HW, spend the remaining
        # block budget on more rows (keeps per-step overhead amortized when the
        # spatial extent is small but N*C is large).
        lane_bytes = _round_up(max(hw_tile, 1), 128) * itemsize
        want_rows = max(8, target_bytes // lane_bytes)
        for cand in (1024, 512, 256, 128, 64, 32, 16, 8):
            if cand <= want_rows and nc % cand == 0:
                row_tile = cand
                break
    return row_tile, hw_tile


# ----------------------------------------------------------------------------
# Kernels
# ----------------------------------------------------------------------------
def _fused_kernel(x_ref, w_ref, b_ref, o_ref, *, n_batch):
    # Whole [N, C, HW] tensor resident in VMEM: stats + apply in one sweep.
    x = x_ref[...].astype(jnp.float32)                       # (N, C, HW)
    hw = x.shape[-1]
    s = jnp.sum(x, axis=-1, keepdims=True)                   # (N, C, 1)
    q = jnp.sum(x * x, axis=-1, keepdims=True)               # (N, C, 1)
    # Reduce over the (static, usually small) batch dim with an unrolled loop.
    s_tot = s[0]
    q_tot = q[0]
    for i in range(1, n_batch):
        s_tot = s_tot + s[i]
        q_tot = q_tot + q[i]
    count = jnp.float32(n_batch * hw)
    mean = s_tot / count                                     # (C, 1)
    # TODO(synk): E[x^2] - mean^2 in f32; use a centered/Welford combine if
    # inputs with |mean| >> std are expected.
    var = jnp.maximum(q_tot / count - mean * mean, 0.0)
    scale = jax.lax.rsqrt(var + BN_EPS) * w_ref[...]         # (C, 1)
    shift = b_ref[...] - mean * scale                        # (C, 1)
    y = x * scale[None] + shift[None]
    o_ref[...] = jax.nn.sigmoid(y).astype(o_ref.dtype)


def _stats_kernel(x_ref, sum_ref, ssq_ref, *, hw, hw_tile, ragged):
    # x_ref: (row_tile, hw_tile) block of [N*C, HW].
    # sum_ref / ssq_ref: (row_tile, 1) accumulators; their block index only
    # depends on the row axis, so they stay VMEM-resident across the lane
    # (reduction) axis and are written back to HBM once per row block.
    @pl.when(pl.program_id(1) == 0)
    def _():
        sum_ref[...] = jnp.zeros_like(sum_ref)
        ssq_ref[...] = jnp.zeros_like(ssq_ref)

    x = x_ref[...].astype(jnp.float32)
    if ragged:
        # Last lane tile may extend past HW: zero the padded lanes so they do
        # not pollute the sums.
        lane = jax.lax.broadcasted_iota(jnp.int32, x.shape, 1)
        base = pl.program_id(1) * hw_tile
        x = jnp.where(base + lane < hw, x, 0.0)

    sum_ref[...] += jnp.sum(x, axis=-1, keepdims=True)
    ssq_ref[...] += jnp.sum(x * x, axis=-1, keepdims=True)


def _apply_kernel(x_ref, scale_ref, shift_ref, o_ref):
    # x_ref/o_ref: (row_tile, hw_tile); scale/shift: (row_tile, 1) broadcast
    # along lanes.  BN + affine folded into one FMA; sigmoid via exp (EUP).
    x = x_ref[...].astype(jnp.float32)
    y = x * scale_ref[...] + shift_ref[...]
    o_ref[...] = jax.nn.sigmoid(y).astype(o_ref.dtype)


# ----------------------------------------------------------------------------
# Pallas-backed paths
# ----------------------------------------------------------------------------
@jax.jit
def _fused_path(x_nchw, weight_map, bias_map):
    N, C, H, W = x_nchw.shape
    HW = H * W
    vmem_limit, _ = _budgets()

    x3 = x_nchw.reshape(N, C, HW)
    w = weight_map.reshape(C, 1).astype(jnp.float32)
    b = bias_map.reshape(C, 1).astype(jnp.float32)

    out3 = pl.pallas_call(
        functools.partial(_fused_kernel, n_batch=N),
        out_shape=jax.ShapeDtypeStruct((N, C, HW), x_nchw.dtype),
        compiler_params=pltpu.CompilerParams(vmem_limit_bytes=vmem_limit),
    )(x3, w, b)
    return out3.reshape(N, C, H, W)


@jax.jit
def _tiled_path(x_nchw, weight_map, bias_map):
    N, C, H, W = x_nchw.shape
    HW = H * W
    NC = N * C
    itemsize = x_nchw.dtype.itemsize
    vmem_limit, block_target = _budgets()

    # Free re-layout: merging contiguous trailing dims moves no data.
    x2 = x_nchw.reshape(NC, HW)
    row_tile, hw_tile = _pick_tiles(NC, HW, itemsize, block_target)
    row_steps = NC // row_tile
    hw_steps = pl.cdiv(HW, hw_tile)
    ragged = (HW % hw_tile) != 0

    # ---- Pass 1: per-row sum / sum-of-squares --------------------------------
    stat_spec = pl.BlockSpec((row_tile, 1), lambda r, h: (r, 0))
    sums, ssq = pl.pallas_call(
        functools.partial(_stats_kernel, hw=HW, hw_tile=hw_tile, ragged=ragged),
        out_shape=(
            jax.ShapeDtypeStruct((NC, 1), jnp.float32),
            jax.ShapeDtypeStruct((NC, 1), jnp.float32),
        ),
        grid_spec=pltpu.PrefetchScalarGridSpec(
            num_scalar_prefetch=0,
            grid=(row_steps, hw_steps),
            in_specs=[
                # Read-only, DMA-dominated sweep: triple-buffer the input.
                pl.BlockSpec((row_tile, hw_tile), lambda r, h: (r, h),
                             pipeline_mode=pl.Buffered(3)),
            ],
            out_specs=(stat_spec, stat_spec),
        ),
        compiler_params=pltpu.CompilerParams(
            dimension_semantics=("parallel", "arbitrary"),
            vmem_limit_bytes=vmem_limit,
        ),
    )(x2)

    # ---- Fold BN stats + per-channel affine into one per-row scale/shift -----
    count = jnp.float32(N * HW)
    mean = jnp.sum(sums.reshape(N, C), axis=0) / count                 # (C,)
    # TODO(synk): E[x^2] - mean^2 in f32; use a centered/Welford combine if
    # inputs with |mean| >> std are expected.
    var = jnp.maximum(jnp.sum(ssq.reshape(N, C), axis=0) / count - mean * mean, 0.0)
    inv_std = jax.lax.rsqrt(var + BN_EPS)
    w = weight_map.reshape(C).astype(jnp.float32)
    b = bias_map.reshape(C).astype(jnp.float32)
    scale_c = inv_std * w                                              # (C,)
    shift_c = b - mean * scale_c                                       # (C,)
    scale_rows = jnp.broadcast_to(scale_c[None, :], (N, C)).reshape(NC, 1)
    shift_rows = jnp.broadcast_to(shift_c[None, :], (N, C)).reshape(NC, 1)

    # ---- Pass 2: fully parallel elementwise apply -----------------------------
    out2 = pl.pallas_call(
        _apply_kernel,
        out_shape=jax.ShapeDtypeStruct((NC, HW), x_nchw.dtype),
        grid_spec=pltpu.PrefetchScalarGridSpec(
            num_scalar_prefetch=0,
            grid=(row_steps, hw_steps),
            in_specs=[
                pl.BlockSpec((row_tile, hw_tile), lambda r, h: (r, h)),
                pl.BlockSpec((row_tile, 1), lambda r, h: (r, 0)),
                pl.BlockSpec((row_tile, 1), lambda r, h: (r, 0)),
            ],
            out_specs=pl.BlockSpec((row_tile, hw_tile), lambda r, h: (r, h)),
        ),
        compiler_params=pltpu.CompilerParams(
            dimension_semantics=("parallel", "parallel"),
            vmem_limit_bytes=vmem_limit,
        ),
    )(x2, scale_rows, shift_rows)

    return out2.reshape(N, C, H, W)


def spatial_wise_fusion(x_nchw, weight_map, bias_map):
    """x_nchw: [N, C, H, W]; weight_map / bias_map: [1, C, 1, 1]."""
    vmem_limit, _ = _budgets()
    # Fused single-pass path when the whole tensor (in + out + ~2 f32 temps)
    # fits comfortably under the VMEM limit; cuts HBM traffic from 2R+1W to
    # 1R+1W and removes one launch + stats-fold round trip.
    fused_est = x_nchw.size * (2 * x_nchw.dtype.itemsize + 2 * 4)
    if fused_est + 4 * _MiB <= vmem_limit:
        return _fused_path(x_nchw, weight_map, bias_map)
    return _tiled_path(x_nchw, weight_map, bias_map)


# ----------------------------------------------------------------------------
# Pure-JAX reference and self-test
# ----------------------------------------------------------------------------
def _reference(x_nchw, weight_map, bias_map):
    # Training-mode BatchNorm2d(affine=False) + per-channel scale/bias + sigmoid.
    # TODO(synk): eval-mode running_mean/running_var bookkeeping is not modeled;
    # this matches the module's training-mode forward (batch statistics).
    x = x_nchw.astype(jnp.float32)
    mean = jnp.mean(x, axis=(0, 2, 3), keepdims=True)
    var = jnp.mean((x - mean) ** 2, axis=(0, 2, 3), keepdims=True)
    xn = (x - mean) / jnp.sqrt(var + BN_EPS)
    return jax.nn.sigmoid(xn * weight_map + bias_map).astype(x_nchw.dtype)


if __name__ == "__main__":
    key = jax.random.PRNGKey(0)
    N, C, H, W = 2, 4, 16, 16

    x = jax.random.normal(key, (N, C, H, W), dtype=jnp.float32)

    # Deterministic params matching nn.Parameter(torch.ones/zeros(1, C, 1, 1)).
    weight_map = jnp.ones((1, C, 1, 1), dtype=jnp.float32)
    bias_map = jnp.zeros((1, C, 1, 1), dtype=jnp.float32)

    ref = _reference(x, weight_map, bias_map)

    # Public entry point (hits the fused single-pass path at this size).
    out = jax.block_until_ready(spatial_wise_fusion(x, weight_map, bias_map))
    assert out.shape == (N, C, H, W)
    assert jnp.allclose(out, ref, atol=1e-5, rtol=1e-5)

    # Also exercise the tiled two-pass path (used for large activation maps).
    out_tiled = jax.block_until_ready(_tiled_path(x, weight_map, bias_map))
    assert jnp.allclose(out_tiled, ref, atol=1e-5, rtol=1e-5)

    print("KERNEL_OK")
</pallas_src>

<mosaic_0001>
module attributes {stable_mosaic.version = 11 : i64} {
  func.func @_fused_kernel(%arg0: memref<2x4x256xf32, #tpu.memory_space<vmem>>, %arg1: memref<4x1xf32, #tpu.memory_space<vmem>>, %arg2: memref<4x1xf32, #tpu.memory_space<vmem>>, %arg3: memref<2x4x256xf32, #tpu.memory_space<vmem>>) attributes {dimension_semantics = [], scalar_prefetch = 0 : i64, scratch_operands = 0 : i64, tpu.core_type = #tpu.core_type<tc>} {
    %c0 = arith.constant 0 : index
    %c0_0 = arith.constant 0 : index
    %c0_1 = arith.constant 0 : index
    %0 = vector.load %arg0[%c0, %c0_0, %c0_1] : memref<2x4x256xf32, #tpu.memory_space<vmem>>, vector<2x4x256xf32>
    %cst = arith.constant dense<0.000000e+00> : vector<2x4xf32>
    %1 = vector.multi_reduction <add>, %0, %cst [2] : vector<2x4x256xf32> to vector<2x4xf32>
    %2 = vector.shape_cast %1 : vector<2x4xf32> to vector<2x4x1xf32>
    %3 = arith.mulf %0, %0 : vector<2x4x256xf32>
    %cst_2 = arith.constant dense<0.000000e+00> : vector<2x4xf32>
    %4 = vector.multi_reduction <add>, %3, %cst_2 [2] : vector<2x4x256xf32> to vector<2x4xf32>
    %5 = vector.shape_cast %4 : vector<2x4xf32> to vector<2x4x1xf32>
    %6 = vector.extract_strided_slice %2 {offsets = [0, 0, 0], sizes = [1, 4, 1], strides = [1, 1, 1]} : vector<2x4x1xf32> to vector<1x4x1xf32>
    %7 = vector.shape_cast %6 : vector<1x4x1xf32> to vector<4x1xf32>
    %8 = vector.extract_strided_slice %5 {offsets = [0, 0, 0], sizes = [1, 4, 1], strides = [1, 1, 1]} : vector<2x4x1xf32> to vector<1x4x1xf32>
    %9 = vector.shape_cast %8 : vector<1x4x1xf32> to vector<4x1xf32>
    %10 = vector.extract_strided_slice %2 {offsets = [1, 0, 0], sizes = [1, 4, 1], strides = [1, 1, 1]} : vector<2x4x1xf32> to vector<1x4x1xf32>
    %11 = vector.shape_cast %10 : vector<1x4x1xf32> to vector<4x1xf32>
    %12 = arith.addf %7, %11 : vector<4x1xf32>
    %13 = vector.extract_strided_slice %5 {offsets = [1, 0, 0], sizes = [1, 4, 1], strides = [1, 1, 1]} : vector<2x4x1xf32> to vector<1x4x1xf32>
    %14 = vector.shape_cast %13 : vector<1x4x1xf32> to vector<4x1xf32>
    %15 = arith.addf %9, %14 : vector<4x1xf32>
    %cst_3 = arith.constant 5.120000e+02 : f32
    %16 = vector.broadcast %cst_3 : f32 to vector<4x1xf32>
    %17 = arith.divf %12, %16 : vector<4x1xf32>
    %cst_4 = arith.constant 5.120000e+02 : f32
    %18 = vector.broadcast %cst_4 : f32 to vector<4x1xf32>
    %19 = arith.divf %15, %18 : vector<4x1xf32>
    %20 = arith.mulf %17, %17 : vector<4x1xf32>
    %21 = arith.subf %19, %20 : vector<4x1xf32>
    %cst_5 = arith.constant 0.000000e+00 : f32
    %22 = vector.broadcast %cst_5 : f32 to vector<4x1xf32>
    %23 = arith.maximumf %21, %22 : vector<4x1xf32>
    %cst_6 = arith.constant 9.99999974E-6 : f32
    %24 = vector.broadcast %cst_6 : f32 to vector<4x1xf32>
    %25 = arith.addf %23, %24 : vector<4x1xf32>
    %26 = math.rsqrt %25 : vector<4x1xf32>
    %c0_7 = arith.constant 0 : index
    %c0_8 = arith.constant 0 : index
    %27 = vector.load %arg1[%c0_7, %c0_8] : memref<4x1xf32, #tpu.memory_space<vmem>>, vector<4x1xf32>
    %28 = arith.mulf %26, %27 : vector<4x1xf32>
    %c0_9 = arith.constant 0 : index
    %c0_10 = arith.constant 0 : index
    %29 = vector.load %arg2[%c0_9, %c0_10] : memref<4x1xf32, #tpu.memory_space<vmem>>, vector<4x1xf32>
    %30 = arith.mulf %17, %28 : vector<4x1xf32>
    %31 = arith.subf %29, %30 : vector<4x1xf32>
    %32 = vector.shape_cast %28 : vector<4x1xf32> to vector<1x4x1xf32>
    %33 = vector.broadcast %32 : vector<1x4x1xf32> to vector<2x4x256xf32>
    %34 = arith.mulf %0, %33 : vector<2x4x256xf32>
    %35 = vector.shape_cast %31 : vector<4x1xf32> to vector<1x4x1xf32>
    %36 = vector.broadcast %35 : vector<1x4x1xf32> to vector<2x4x256xf32>
    %37 = arith.addf %34, %36 : vector<2x4x256xf32>
    %38 = arith.negf %37 : vector<2x4x256xf32>
    %39 = math.exp %38 : vector<2x4x256xf32>
    %cst_11 = arith.constant 1.000000e+00 : f32
    %40 = vector.broadcast %cst_11 : f32 to vector<2x4x256xf32>
    %41 = arith.addf %40, %39 : vector<2x4x256xf32>
    %42 = arith.divf %40, %41 : vector<2x4x256xf32>
    %c0_12 = arith.constant 0 : index
    %c0_13 = arith.constant 0 : index
    %c0_14 = arith.constant 0 : index
    %43 = vector.load %arg3[%c0_12, %c0_13, %c0_14] : memref<2x4x256xf32, #tpu.memory_space<vmem>>, vector<2x4x256xf32>
    tpu.vector_store %arg3[%c0_12, %c0_13, %c0_14], %42 {strides = array<i32>} : memref<2x4x256xf32, #tpu.memory_space<vmem>>, vector<2x4x256xf32>,
    return
  }
}

</mosaic_0001>

<bundles_post_ra>
// kernel: _fused_path.1
= control target key start
LH: loop header
LB: loop body
LE: loop exit
PB: predicated region body
PF: predicated region fallthrough
CT: control target
= control target key end

     0   :  { %vm22_vm0 = vcmask 1043456   ;;  %v130_v20 = vmov 0   ;;  %v131_v39 = vmov 839922192   ;;  %v73_v41 = vlaneseq  ;;  %s178_s0 = inlined_call_operand.vmem [shape: f32[2,4,256], index: 0, kind: input, shape index: {}]   ;;  %s179_s1 = inlined_call_operand.vmem [shape: f32[4,1], index: 1, kind: input, shape index: {}]   ;;  %s180_s2 = inlined_call_operand.vmem [shape: f32[4,1], index: 2, kind: input, shape index: {}]   ;;  %s181_s3 = inlined_call_operand.vmem [shape: f32[2,4,256], index: 3, kind: output, shape index: {}]  }
   0x1   :  { %v14_v0 = vld [vmem:[%s178_s0] sm:$0xff]  ;;  %v15_v1 = vld [vmem:[%s178_s0 + $0x8] sm:$0xff]  ;;  %116 = vset.pattern.permute.xlu0 %v130_v20  ;;  %117 = vset.pattern.permute.xlu1 %v130_v20  ;;  %v71_v40 = vunpack.c.l.s4 %v131_v39 }
   0x2   :  { %v18_v2 = vcombine.high %v14_v0, %v14_v0  ;;  %v23_v3 = vsel %vm22_vm0, %v14_v0, 0.0  ;;  %v33_v4 = vmul.f32 %v14_v0, %v14_v0  ;;  %v19_v5 = vcombine.high %v15_v1, %v15_v1  ;;  %v61_v33 = vld [vmem:[%s179_s1] sm:$0xf] }
   0x3   :  { %v28_v6 = vsel %vm22_vm0, %v15_v1, 0.0  ;;  %v34_v7 = vmul.f32 %v15_v1, %v15_v1  ;;  %v63_v36 = vld [vmem:[%s180_s2] sm:$0xf]  ;;  %v72_v42 = vunpack.c.0.s8 %v71_v40  ;;  %v74_v43 = vshrl.u32 %v73_v41, 7 }
   0x4   :  { %v24_v8 = vsel %vm22_vm0, %v18_v2, 0.0  ;;  %v37_v9 = vcombine.high %v33_v4, %v33_v4  ;;  %v41_v10 = vsel %vm22_vm0, %v33_v4, 0.0  ;;  %v29_v11 = vsel %vm22_vm0, %v19_v5, 0.0 }
   0x5   :  { %v25_v12 = vadd.f32 %v24_v8, %v23_v3  ;;  %v38_v13 = vcombine.high %v34_v7, %v34_v7  ;;  %v46_v15 = vsel %vm22_vm0, %v34_v7, 0.0  ;;  %v30_v17 = vadd.f32 %v29_v11, %v28_v6 }
   0x6   :  { %v42_v14 = vsel %vm22_vm0, %v37_v9, 0.0  ;;  %v75_v44 = vsub.s32 %v72_v42, %v74_v43 }
   0x7   :  { %26 = vadd.xlane.f32.xlu0 %v25_v12  ;;  %v43_v16 = vadd.f32 %v42_v14, %v41_v10  ;;  %v47_v18 = vsel %vm22_vm0, %v38_v13, 0.0 }
   0x8   :  { %v48_v19 = vadd.f32 %v47_v18, %v46_v15 }
   0x9   :  { %44 = vadd.xlane.f32.xlu1 %v43_v16 }
   0xb   :  { %31 = vadd.xlane.f32.xlu0 %v30_v17 }
   0xd   :  { %49 = vadd.xlane.f32.xlu1 %v48_v19 }
  0x94   :  { %v27_v21 = vpop.xlane.xlu0 %26 }
  0x96   :  { %v45_v22 = vpop.xlane.xlu1 %44 }
  0x98   :  { %v32_v23 = vpop.xlane.xlu0 %31 }
  0x99   :  { %v51_v24 = vadd.f32 %v32_v23, %v27_v21 }
  0x9a   :  { %v50_v25 = vpop.xlane.xlu1 %49 }
  0x9b   :  { %v54_v26 = vmul.f32 0.001953125, %v51_v24  ;;  %v52_v27 = vadd.f32 %v50_v25, %v45_v22 }
  0x9d   :  { %v56_v28 = vmul.f32 %v54_v26, %v54_v26  ;;  %v55_v29 = vmul.f32 0.001953125, %v52_v27 }
  0x9f   :  { %v57_v30 = vsub.f32 %v55_v29, %v56_v28 }
  0xa1   :  { %v58_v31 = vmax.f32 %v57_v30, 0.0 }
  0xa3   :  { %v59_v32 = vadd.f32 1e-05, %v58_v31 }
  0xa5   :  { %120 = vrsqrt.f32 %v59_v32 }
  0xaf   :  { %v121_v34 = vpop.eup %120 }
  0xb0   :  { %v62_v35 = vmul.f32 %v121_v34, %v61_v33 }
  0xb2   :  { %68 = vperm.xlu0 %116, %v62_v35   ;;  %v64_v37 = vmul.f32 %v62_v35, %v54_v26 }
  0xb4   :  { %v65_v38 = vsub.f32 %v63_v36, %v64_v37 }
  0xb6   :  { %82 = vperm.xlu1 %117, %v65_v38  }
 0x131   :  { %v69_v45 = vpop.permute.xlu0 %68 }
 0x132   :  { %v76_v46 = vrot.slane %v69_v45, %v75_v44 }
 0x134   :  { %v78_v48 = vmul.f32 %v76_v46, %v14_v0  ;;  %v79_v49 = vmul.f32 %v76_v46, %v15_v1 }
 0x135   :  { %v83_v47 = vpop.permute.xlu1 %82 }
 0x136   :  { %v90_v50 = vrot.slane %v83_v47, %v75_v44 }
 0x138   :  { %v92_v51 = vadd.f32 %v90_v50, %v78_v48  ;;  %v93_v52 = vadd.f32 %v90_v50, %v79_v49 }
 0x13a   :  { %v112_v53 = vmul.f32 -1.442695, %v92_v51  ;;  %v113_v54 = vmul.f32 -1.442695, %v93_v52 }
 0x13c   :  { %122 = vpow2.f32 %v112_v53 }
 0x13d   :  { %124 = vpow2.f32 %v113_v54 }
 0x146   :  { %v123_v55 = vpop.eup %122 }
 0x147   :  { %v125_v56 = vpop.eup %124  ;;  %v100_v57 = vadd.f32 1.0, %v123_v55 }
 0x148   :  { %v101_v58 = vadd.f32 1.0, %v125_v56 }
 0x149   :  { %126 = vrcp.f32 %v100_v57 }
 0x14a   :  { %128 = vrcp.f32 %v101_v58 }
 0x153   :  { %v127_v59 = vpop.eup %126 }
 0x154   :  { %v129_v60 = vpop.eup %128  ;;  %106 = vst [vmem:[%s181_s3] sm:$0xff] %v127_v59 }
 0x155   :  { %107 = vst [vmem:[%s181_s3 + $0x8] sm:$0xff] %v129_v60 }

</bundles_post_ra>
